<compile_context>
chip_gen: v7x
topology: tpu7x:2x2x1
jax: 0.10.0
libtpu: 0.0.40
codegen_flags: <defaults>
</compile_context>

<pallas_src>
import jax
import jax.numpy as jnp
from jax.experimental import pallas as pl
from jax.experimental.pallas import tpu as pltpu


_LANE = 128
_MAX_TK = 2048                 # K tile cap when K must be tiled
_W_TILE_BYTES = 8 << 20        # per-buffer bf16 W tile budget (x2 double-buffered)
_VMEM_CAP_BYTES = 48 << 20     # stay well under v7x's 64 MiB physical VMEM


def _round_up(v, m):
    return (v + m - 1) // m * m


def _split_even(dim_pad, max_tile):
    """Split a 128-aligned dim into equal 128-aligned tiles with minimal extra pad."""
    n = max(1, -(-dim_pad // max_tile))            # ceil
    tile = _round_up(-(-dim_pad // n), _LANE)      # ceil(dim/n) aligned to 128
    return tile, n * tile                          # (tile, padded dim)


def _choose_layout(d_in, d_out, w_tile_bytes, max_tk):
    k_base = _round_up(d_in, _LANE)
    n_base = _round_up(d_out, _LANE)

    if k_base * _LANE * 2 <= w_tile_bytes:
        # Full-K W blocks fit the per-buffer budget -> collapse the K grid axis.
        tk, k_pad = None, k_base
        tn_cap = (w_tile_bytes // (2 * k_pad)) // _LANE * _LANE
    else:
        tk, k_pad = _split_even(k_base, max_tk)
        tn_cap = max(_LANE, (w_tile_bytes // (2 * tk)) // _LANE * _LANE)

    tn, n_pad = _split_even(n_base, tn_cap)
    return tk, k_pad, tn, n_pad


def prepare_params(weight, bias, *, w_tile_bytes=_W_TILE_BYTES, max_tk=_MAX_TK):
    """One-time (init-time) parameter prep, off the hot path.

    Transposes the PyTorch (D_out, D_in) weight to MXU-natural (K, N), casts to
    bf16, and zero-pads both dims to the chosen tile multiples.
    """
    d_out, d_in = weight.shape
    tk, k_pad, tn, n_pad = _choose_layout(d_in, d_out, w_tile_bytes, max_tk)

    w = jnp.zeros((k_pad, n_pad), jnp.bfloat16)
    w = w.at[:d_in, :d_out].set(weight.T.astype(jnp.bfloat16))
    b = jnp.zeros((1, n_pad), jnp.float32)
    b = b.at[0, :d_out].set(bias.astype(jnp.float32))

    meta = dict(d_in=d_in, d_out=d_out, tk=tk, k_pad=k_pad, tn=tn, n_pad=n_pad)
    return w, b, meta


def _embed_kernel_fullk(x_ref, w_ref, b_ref, o_ref):
    # Grid = (N tiles,). One (1, K) @ (K, tn) dot per step; bias + ReLU fused.
    y = jnp.dot(x_ref[...], w_ref[...], preferred_element_type=jnp.float32)
    o_ref[...] = jnp.maximum(y + b_ref[...], 0.0)


def _embed_kernel_ktiled(x_ref, w_ref, b_ref, o_ref):
    # Grid = (N tiles, K tiles).  x fully resident; f32 output block is resident
    # across K and doubles as the accumulator (bias folded into the k==0 init).
    k = pl.program_id(1)
    tk = w_ref.shape[0]

    @pl.when(k == 0)
    def _():
        o_ref[...] = b_ref[...]

    start = pl.multiple_of(k * tk, _LANE)
    o_ref[...] += jnp.dot(x_ref[:, pl.ds(start, tk)], w_ref[...],
                          preferred_element_type=jnp.float32)

    @pl.when(k == pl.num_programs(1) - 1)
    def _():
        o_ref[...] = jnp.maximum(o_ref[...], 0.0)


def sample_embedder(x, w_padded, b_padded, meta):
    """Pallas equivalent of SampleEmbedder.forward: relu(x.view(1,-1) @ W.T + b)."""
    d_in, d_out = meta["d_in"], meta["d_out"]
    tk, k_pad = meta["tk"], meta["k_pad"]
    tn, n_pad = meta["tn"], meta["n_pad"]

    assert x.size == d_in, (
        f"SampleEmbedder expects prod(x.shape) == input_dim ({d_in}), got {x.size}")

    x_flat = x.reshape(1, -1).astype(jnp.bfloat16)
    if d_in < k_pad:                      # cheap: x is a single row
        x_flat = jnp.pad(x_flat, ((0, 0), (0, k_pad - d_in)))

    w_tile_k = k_pad if tk is None else tk
    # Double-buffered worst case for every operand + compiler headroom,
    # capped for v7x's 64 MiB physical VMEM.
    vmem_bytes = 2 * (2 * k_pad            # x (bf16, resident)
                      + 2 * w_tile_k * tn  # W tile (bf16)
                      + 4 * tn             # bias (f32)
                      + 4 * tn)            # output tile (f32)
    vmem_limit = min(vmem_bytes + (8 << 20), _VMEM_CAP_BYTES)

    cost = pl.CostEstimate(
        flops=2 * k_pad * n_pad,
        transcendentals=0,
        bytes_accessed=2 * k_pad * n_pad + 2 * k_pad + 4 * n_pad + 4 * n_pad,
    )

    if tk is None:
        grid = (n_pad // tn,)
        kernel = _embed_kernel_fullk
        in_specs = [
            pl.BlockSpec((1, k_pad), lambda j: (0, 0)),     # x (resident)
            pl.BlockSpec((k_pad, tn), lambda j: (0, j)),    # full-K W column block
            pl.BlockSpec((1, tn), lambda j: (0, j)),        # bias slice
        ]
        out_spec = pl.BlockSpec((1, tn), lambda j: (0, j))
        semantics = ("parallel",)
    else:
        grid = (n_pad // tn, k_pad // tk)                   # K last (reduction)
        kernel = _embed_kernel_ktiled
        in_specs = [
            pl.BlockSpec((1, k_pad), lambda j, k: (0, 0)),  # x (resident)
            pl.BlockSpec((tk, tn), lambda j, k: (k, j)),    # W tile
            pl.BlockSpec((1, tn), lambda j, k: (0, j)),     # bias slice
        ]
        out_spec = pl.BlockSpec((1, tn), lambda j, k: (0, j))
        semantics = ("parallel", "arbitrary")

    out_padded = pl.pallas_call(
        kernel,
        out_shape=jax.ShapeDtypeStruct((1, n_pad), jnp.float32),
        grid_spec=pltpu.PrefetchScalarGridSpec(
            num_scalar_prefetch=0,
            grid=grid,
            in_specs=in_specs,
            out_specs=out_spec,
        ),
        compiler_params=pltpu.CompilerParams(
            dimension_semantics=semantics,
            vmem_limit_bytes=vmem_limit,
        ),
        cost_estimate=cost,
    )(x_flat, w_padded, b_padded)

    return out_padded[:, :d_out]


if __name__ == "__main__":
    # x.view(1, -1) implies input_dim == prod(x.shape).
    # x = (2, 4, 16, 16) -> input_dim = 2048, output_dim = 256.
    x_shape = (2, 4, 16, 16)
    input_dim = 2 * 4 * 16 * 16
    output_dim = 256

    key = jax.random.PRNGKey(0)
    kx, kw, kb = jax.random.split(key, 3)

    x = jax.random.normal(kx, x_shape, dtype=jnp.float32)

    # Deterministic parameter init mimicking nn.Linear default (uniform ±1/sqrt(in)).
    bound = 1.0 / (float(input_dim) ** 0.5)
    weight = jax.random.uniform(kw, (output_dim, input_dim),
                                minval=-bound, maxval=bound, dtype=jnp.float32)
    bias = jax.random.uniform(kb, (output_dim,),
                              minval=-bound, maxval=bound, dtype=jnp.float32)

    # Pure-JAX reference with the same bf16 weights/activations, f32 math.
    x_bf = x.reshape(1, -1).astype(jnp.bfloat16).astype(jnp.float32)
    w_bf = weight.astype(jnp.bfloat16).astype(jnp.float32)
    ref = jnp.maximum(x_bf @ w_bf.T + bias.astype(jnp.float32), 0.0)

    # Path 1: full-K collapsed grid (default tile budget -> W fits one block).
    w_p, b_p, meta = prepare_params(weight, bias)
    out = jax.block_until_ready(sample_embedder(x, w_p, b_p, meta))
    assert out.shape == (1, output_dim)
    assert jnp.allclose(out, ref, atol=1e-2, rtol=1e-2), \
        float(jnp.max(jnp.abs(out - ref)))

    # Path 2: force the K-tiled accumulation path with a tiny tile budget so the
    # 2-D grid / output-accumulator code is exercised at small shapes too.
    w_p2, b_p2, meta2 = prepare_params(weight, bias,
                                       w_tile_bytes=256 << 10, max_tk=512)
    assert meta2["tk"] is not None  # really took the tiled path
    out2 = jax.block_until_ready(sample_embedder(x, w_p2, b_p2, meta2))
    assert out2.shape == (1, output_dim)
    assert jnp.allclose(out2, ref, atol=1e-2, rtol=1e-2), \
        float(jnp.max(jnp.abs(out2 - ref)))

    print("KERNEL_OK")
</pallas_src>

<mosaic_0001>
module attributes {stable_mosaic.version = 11 : i64} {
  func.func @_embed_kernel_fullk(%arg0: i32, %arg1: memref<1x2048xbf16, #tpu.memory_space<vmem>>, %arg2: memref<2048x256xbf16, #tpu.memory_space<vmem>>, %arg3: memref<1x256xf32, #tpu.memory_space<vmem>>, %arg4: memref<1x256xf32, #tpu.memory_space<vmem>>) attributes {dimension_semantics = [#tpu.dimension_semantics<parallel>], iteration_bounds = array<i64: 1>, scalar_prefetch = 0 : i64, scratch_operands = 0 : i64, tpu.core_type = #tpu.core_type<tc>, window_params = [{pipeline_mode = #tpu.pipeline_mode<synchronous>, transform_indices = @transform_0, window_bounds = array<i64: 1, 2048>}, {transform_indices = @transform_1, window_bounds = array<i64: 2048, 256>}, {transform_indices = @transform_2, window_bounds = array<i64: 1, 256>}, {transform_indices = @transform_3, window_bounds = array<i64: 1, 256>}]} {
    %c0 = arith.constant 0 : index
    %c0_0 = arith.constant 0 : index
    %0 = vector.load %arg1[%c0, %c0_0] : memref<1x2048xbf16, #tpu.memory_space<vmem>>, vector<1x2048xbf16>
    %c0_1 = arith.constant 0 : index
    %c0_2 = arith.constant 0 : index
    %1 = vector.load %arg2[%c0_1, %c0_2] : memref<2048x256xbf16, #tpu.memory_space<vmem>>, vector<2048x256xbf16>
    %cst = arith.constant dense<0.000000e+00> : vector<1x256xf32>
    %2 = tpu.matmul %0, %1, %cst {dimension_numbers = #tpu.dot_dimension_numbers<[1], [0], [0], [1], [0, 0, 1, 1], [], []>} : vector<1x2048xbf16>, vector<2048x256xbf16>, vector<1x256xf32> -> vector<1x256xf32>
    %c0_3 = arith.constant 0 : index
    %c0_4 = arith.constant 0 : index
    %3 = vector.load %arg3[%c0_3, %c0_4] : memref<1x256xf32, #tpu.memory_space<vmem>>, vector<1x256xf32>
    %4 = arith.addf %2, %3 : vector<1x256xf32>
    %cst_5 = arith.constant 0.000000e+00 : f32
    %5 = vector.broadcast %cst_5 : f32 to vector<1x256xf32>
    %6 = arith.maximumf %4, %5 : vector<1x256xf32>
    %c0_6 = arith.constant 0 : index
    %c0_7 = arith.constant 0 : index
    %7 = vector.load %arg4[%c0_6, %c0_7] : memref<1x256xf32, #tpu.memory_space<vmem>>, vector<1x256xf32>
    tpu.vector_store %arg4[%c0_6, %c0_7], %6 {strides = array<i32>} : memref<1x256xf32, #tpu.memory_space<vmem>>, vector<1x256xf32>,
    return
  }
  func.func @transform_0(%arg0: i32) -> (i32, i32) {
    %c0_i32 = arith.constant 0 : i32
    %c0_i32_0 = arith.constant 0 : i32
    %c0_i32_1 = arith.constant 0 : i32
    return %c0_i32, %c0_i32_0 : i32, i32
  }
  func.func @transform_1(%arg0: i32) -> (i32, i32) {
    %c0_i32 = arith.constant 0 : i32
    %c0_i32_0 = arith.constant 0 : i32
    return %c0_i32, %arg0 : i32, i32
  }
  func.func @transform_2(%arg0: i32) -> (i32, i32) {
    %c0_i32 = arith.constant 0 : i32
    %c0_i32_0 = arith.constant 0 : i32
    return %c0_i32, %arg0 : i32, i32
  }
  func.func @transform_3(%arg0: i32) -> (i32, i32) {
    %c0_i32 = arith.constant 0 : i32
    %c0_i32_0 = arith.constant 0 : i32
    return %c0_i32, %arg0 : i32, i32
  }
}

</mosaic_0001>

<bundles_post_ra>
// kernel: tpu_custom_call.1
= control target key start
LH: loop header
LB: loop body
LE: loop exit
PB: predicated region body
PF: predicated region fallthrough
CT: control target
= control target key end

     0   :  { %8 = vsyncpa [#allocation3], 0  ;;  %s2969_s0 = inlined_call_operand.hbm [shape: bf16[1,2048], index: 0, kind: input, shape index: {}]   ;;  %s2970_s1 = inlined_call_operand.hbm [shape: bf16[2048,256], index: 1, kind: input, shape index: {}]   ;;  %s2971_s2 = inlined_call_operand.vmem [shape: f32[1,256], index: 2, kind: input, shape index: {}]   ;;  %s2972_s3 = inlined_call_operand.hbm [shape: f32[1,256], index: 3, kind: output, shape index: {}]  }
   0x1   :  { %9 = vsyncpa [#allocation6], 0 }
   0x2   :  { %10 = vsyncpa [#allocation4], 0  ;;  %s2824_s12 = smov [#allocation2]   ;;  %s2825_s14 = smov [#allocation5]  }
   0x3   :  { %s17_s13 = sshll.u32 %s2824_s12, 4  ;;  %s26_s15 = sshll.u32 %s2825_s14, 4  ;;  %s18_s13 = int_to_ptr.vmem [resolvable:$true] %s17_s13  ;;  %s2850_s15 = int_to_ptr.vmem [resolvable:$true] %s26_s15 }
   0x4   :  { %s2752_s18 = scalar_lea.hbm %s2969_s0, 256 }
   0x5   :  { %p2753_p0 = scmp.ne.s32.totalorder %s2969_s0, %s2752_s18  ;;  %p2756_p1 = scmp.lt.u32.totalorder %s2752_s18, %s2969_s0 }
   0x7   :  { %p2758_p2 = pnand %p2756_p1, %p2753_p0 }
   0x9   :  { %2761 = shalt.err (!%p2758_p2)
}
   0xa   :  { %s2762_s23 = scalar_lea.vmem %s18_s13, 256  ;;  %p2767_p4 = scmp.lt.s32.totalorder %s18_s13, %s18_s13 }
   0xb   :  { %p2763_p3 = scmp.ne.s32.totalorder %s18_s13, %s2762_s23  ;;  %p2768_p5 = scmp.lt.s32.totalorder %s2762_s23, %s2762_s23 }
   0xd   :  { %p2769_p6 = por %p2768_p5, %p2767_p4 }
   0xf   :  { %p2770_p7 = pnand %p2769_p6, %p2763_p3 }
  0x11   :  { %2773 = shalt.err (!%p2770_p7)
}
  0x12   :  { %20 = dma.hbm_to_vmem [thread:$0]  %s2969_s0, 256, %s18_s13, [#allocation3]  }
  0x13   :  { %s2774_s28 = scalar_lea.hbm %s2970_s1, 32768 }
  0x14   :  { %p2775_p8 = scmp.ne.s32.totalorder %s2970_s1, %s2774_s28  ;;  %p2778_p9 = scmp.lt.u32.totalorder %s2774_s28, %s2970_s1 }
  0x16   :  { %p2780_p10 = pnand %p2778_p9, %p2775_p8 }
  0x18   :  { %2783 = shalt.err (!%p2780_p10)
}
  0x19   :  { %s2784_s6 = scalar_lea.vmem %s2850_s15, 32768  ;;  %p2789_p12 = scmp.lt.s32.totalorder %s2850_s15, %s2850_s15 }
  0x1a   :  { %p2785_p11 = scmp.ne.s32.totalorder %s2850_s15, %s2784_s6  ;;  %p2790_p13 = scmp.lt.s32.totalorder %s2784_s6, %s2784_s6 }
  0x1c   :  { %p2791_p0 = por %p2790_p13, %p2789_p12 }
  0x1e   :  { %p2792_p1 = pnand %p2791_p0, %p2785_p11 }
  0x20   :  { %2795 = shalt.err (!%p2792_p1)
}
  0x21   :  { %s2826_s0 = smov 128   ;;  %s2827_s7 = smov 8  }
  0x22   :  { %32 = dma.hbm_to_vmem [thread:$0]  %s2970_s1, 32768, %s2850_s15, [#allocation6], %s2826_s0, %s2826_s0, %s2827_s7  }
  0x23   :  { %2818 = dma.done.wait [#allocation3], 256  }
  0x24   :  { %2819 = vsyncadd [#allocation3], 4294967040 }
  0x25   :  { %2820 = dma.done.wait [#allocation6], 32768  }
  0x26   :  { %2821 = vsyncadd [#allocation6], 4294934528  ;;  %v2366_v0 = vld [vmem:[#allocation5 + $0x4] ss:$8 sps:$4 sm:$0xff]   ;;  %v2370_v2 = vld [vmem:[#allocation5] ss:$8 sps:$4 sm:$0xff]   ;;  %v306_v38 = vlaneseq }
  0x27   :  { %v2368_v1 = vld [vmem:[#allocation5 + $0x404] ss:$8 sps:$4 sm:$0xff]   ;;  %1707 = vmatprep.subr.bf16.mxu1 %v2366_v0  ;;  %v2371_v3 = vld [vmem:[#allocation5 + $0x400] ss:$8 sps:$4 sm:$0xff]   ;;  %v2372_v4 = vld [vmem:[#allocation5 + $0x14] ss:$8 sps:$4 sm:$0xff]  }
  0x28   :  { %1871 = vmatprep.subr.bf16.mxu0 %v2368_v1  ;;  %1708 = vmatpush1.bf16.msra.mxu1 %v2370_v2  ;;  %v2374_v5 = vld [vmem:[#allocation5 + $0x414] ss:$8 sps:$4 sm:$0xff]   ;;  %v2376_v6 = vld [vmem:[#allocation5 + $0x10] ss:$8 sps:$4 sm:$0xff]   ;;  %v2378_v8 = vld [vmem:[#allocation5 + $0x24] ss:$8 sps:$4 sm:$0xff]  }
  0x29   :  { %1872 = vmatpush1.bf16.msra.mxu0 %v2371_v3  ;;  %1709 = vmatprep.subr.bf16.mxu1 %v2372_v4  ;;  %v2377_v7 = vld [vmem:[#allocation5 + $0x410] ss:$8 sps:$4 sm:$0xff]   ;;  %v2380_v9 = vld [vmem:[#allocation5 + $0x424] ss:$8 sps:$4 sm:$0xff]   ;;  %v2382_v10 = vld [vmem:[#allocation5 + $0x20] ss:$8 sps:$4 sm:$0xff]  }
  0x2a   :  { %1873 = vmatprep.subr.bf16.mxu0 %v2374_v5  ;;  %v2383_v11 = vld [vmem:[#allocation5 + $0x420] ss:$8 sps:$4 sm:$0xff]   ;;  %v2384_v12 = vld [vmem:[#allocation5 + $0x34] ss:$8 sps:$4 sm:$0xff]   ;;  %v2388_v14 = vld [vmem:[#allocation5 + $0x30] ss:$8 sps:$4 sm:$0xff]  }
  0x2b   :  { %v2386_v13 = vld [vmem:[#allocation5 + $0x434] ss:$8 sps:$4 sm:$0xff]   ;;  %v2389_v15 = vld [vmem:[#allocation5 + $0x430] ss:$8 sps:$4 sm:$0xff]   ;;  %v2390_v16 = vld [vmem:[#allocation5 + $0x44] ss:$8 sps:$4 sm:$0xff]  }
  0x2c   :  { %1710 = vmatpush1.bf16.msra.mxu1 %v2376_v6  ;;  %v2392_v17 = vld [vmem:[#allocation5 + $0x444] ss:$8 sps:$4 sm:$0xff]   ;;  %v2394_v18 = vld [vmem:[#allocation5 + $0x40] ss:$8 sps:$4 sm:$0xff]   ;;  %v2396_v20 = vld [vmem:[#allocation5 + $0x54] ss:$8 sps:$4 sm:$0xff]  }
  0x2d   :  { %1874 = vmatpush1.bf16.msra.mxu0 %v2377_v7  ;;  %1711 = vmatprep.subr.bf16.mxu1 %v2378_v8  ;;  %v2395_v19 = vld [vmem:[#allocation5 + $0x440] ss:$8 sps:$4 sm:$0xff]   ;;  %v2398_v21 = vld [vmem:[#allocation5 + $0x454] ss:$8 sps:$4 sm:$0xff]   ;;  %v2400_v22 = vld [vmem:[#allocation5 + $0x50] ss:$8 sps:$4 sm:$0xff]  }
  0x2e   :  { %1875 = vmatprep.subr.bf16.mxu0 %v2380_v9  ;;  %v2401_v23 = vld [vmem:[#allocation5 + $0x450] ss:$8 sps:$4 sm:$0xff]   ;;  %v2402_v24 = vld [vmem:[#allocation5 + $0x64] ss:$8 sps:$4 sm:$0xff]   ;;  %v2406_v26 = vld [vmem:[#allocation5 + $0x60] ss:$8 sps:$4 sm:$0xff]  }
  0x2f   :  { %v2404_v25 = vld [vmem:[#allocation5 + $0x464] ss:$8 sps:$4 sm:$0xff]   ;;  %v2407_v27 = vld [vmem:[#allocation5 + $0x460] ss:$8 sps:$4 sm:$0xff]   ;;  %v2408_v28 = vld [vmem:[#allocation5 + $0x74] ss:$8 sps:$4 sm:$0xff]  }
  0x30   :  { %1712 = vmatpush1.bf16.msra.mxu1 %v2382_v10  ;;  %v2410_v29 = vld [vmem:[#allocation5 + $0x474] ss:$8 sps:$4 sm:$0xff]   ;;  %v2412_v30 = vld [vmem:[#allocation5 + $0x70] ss:$8 sps:$4 sm:$0xff]   ;;  %v2414_v32 = vld [vmem:[#allocation5 + $0x84] ss:$8 sps:$4 sm:$0xff]  }
  0x31   :  { %1876 = vmatpush1.bf16.msra.mxu0 %v2383_v11  ;;  %1713 = vmatprep.subr.bf16.mxu1 %v2384_v12  ;;  %v2413_v31 = vld [vmem:[#allocation5 + $0x470] ss:$8 sps:$4 sm:$0xff]   ;;  %v2416_v33 = vld [vmem:[#allocation5 + $0x484] ss:$8 sps:$4 sm:$0xff]   ;;  %v2418_v34 = vld [vmem:[#allocation5 + $0x80] ss:$8 sps:$4 sm:$0xff]  }
  0x32   :  { %1877 = vmatprep.subr.bf16.mxu0 %v2386_v13  ;;  %v2419_v35 = vld [vmem:[#allocation5 + $0x480] ss:$8 sps:$4 sm:$0xff]   ;;  %v2828_v36 = vmov 1966171168   ;;  %v2420_v39 = vld [vmem:[#allocation5 + $0x94] ss:$8 sps:$4 sm:$0xff]  }
  0x33   :  { %v304_v37 = vunpack.c.l.s4 %v2828_v36  ;;  %v2422_v40 = vld [vmem:[#allocation5 + $0x494] ss:$8 sps:$4 sm:$0xff]   ;;  %v2424_v41 = vld [vmem:[#allocation5 + $0x90] ss:$8 sps:$4 sm:$0xff]   ;;  %v2882_v43 = vshrl.u32 %v306_v38, 7  ;;  %vm2057_vm0 = vcmp.lt.s32.totalorder %v306_v38, 256 }
  0x34   :  { %1714 = vmatpush1.bf16.msra.mxu1 %v2388_v14  ;;  %v2425_v44 = vld [vmem:[#allocation5 + $0x490] ss:$8 sps:$4 sm:$0xff]   ;;  %v2426_v45 = vld [vmem:[#allocation5 + $0xa4] ss:$8 sps:$4 sm:$0xff]   ;;  %v2430_v47 = vld [vmem:[#allocation5 + $0xa0] ss:$8 sps:$4 sm:$0xff]  }
  0x35   :  { %1878 = vmatpush1.bf16.msra.mxu0 %v2389_v15  ;;  %1715 = vmatprep.subr.bf16.mxu1 %v2390_v16  ;;  %v305_v42 = vunpack.c.0.s8 %v304_v37  ;;  %v2428_v46 = vld [vmem:[#allocation5 + $0x4a4] ss:$8 sps:$4 sm:$0xff]   ;;  %v2431_v48 = vld [vmem:[#allocation5 + $0x4a0] ss:$8 sps:$4 sm:$0xff]   ;;  %v2432_v50 = vld [vmem:[#allocation5 + $0xb4] ss:$8 sps:$4 sm:$0xff]  }
  0x36   :  { %1879 = vmatprep.subr.bf16.mxu0 %v2392_v17  ;;  %v2434_v51 = vld [vmem:[#allocation5 + $0x4b4] ss:$8 sps:$4 sm:$0xff]   ;;  %v2436_v53 = vld [vmem:[#allocation5 + $0xb0] ss:$8 sps:$4 sm:$0xff]   ;;  %v2438_v57 = vld [vmem:[#allocation5 + $0xc4] ss:$8 sps:$4 sm:$0xff]  }
  0x37   :  { %v2885_v49 = vsub.s32 %v305_v42, %v2882_v43  ;;  %v2887_v52 = vld [vmem:[#allocation2] sm:$0xff]  ;;  %v2891_v56 = vld [vmem:[#allocation2 + $0x8] sm:$0xff]  ;;  %v2440_v58 = vld [vmem:[#allocation5 + $0x4c4] ss:$8 sps:$4 sm:$0xff]  }
  0x38   :  { %1716 = vmatpush1.bf16.msra.mxu1 %v2394_v18  ;;  %v2437_v55 = vld [vmem:[#allocation5 + $0x4b0] ss:$8 sps:$4 sm:$0xff]   ;;  %v2442_v63 = vld [vmem:[#allocation5 + $0xc0] ss:$8 sps:$4 sm:$0xff]   ;;  %v2444_v1 = vld [vmem:[#allocation5 + $0xd4] ss:$8 sps:$4 sm:$0xff]  }
  0x39   :  { %1880 = vmatpush1.bf16.msra.mxu0 %v2395_v19  ;;  %1717 = vmatprep.subr.bf16.mxu1 %v2396_v20  ;;  %v309_v54 = vrot.slane %v2887_v52, %v2885_v49  ;;  %v358_v60 = vrot.slane %v2891_v56, %v2885_v49  ;;  %v2443_v0 = vld [vmem:[#allocation5 + $0x4c0] ss:$8 sps:$4 sm:$0xff]   ;;  %v2446_v2 = vld [vmem:[#allocation5 + $0x4d4] ss:$8 sps:$4 sm:$0xff]   ;;  %v2448_v4 = vld [vmem:[#allocation5 + $0xd0] ss:$8 sps:$4 sm:$0xff]  }
  0x3a   :  { %1881 = vmatprep.subr.bf16.mxu0 %v2398_v21  ;;  %v2449_v5 = vld [vmem:[#allocation5 + $0x4d0] ss:$8 sps:$4 sm:$0xff]   ;;  %v2450_v6 = vld [vmem:[#allocation5 + $0xe4] ss:$8 sps:$4 sm:$0xff]   ;;  %v2454_v8 = vld [vmem:[#allocation5 + $0xe0] ss:$8 sps:$4 sm:$0xff]  }
  0x3b   :  { %v317_v59 = vcombine.high %v309_v54, %v309_v54  ;;  %v366_v62 = vcombine.high %v358_v60, %v358_v60  ;;  %v2452_v7 = vld [vmem:[#allocation5 + $0x4e4] ss:$8 sps:$4 sm:$0xff]   ;;  %v2455_v9 = vld [vmem:[#allocation5 + $0x4e0] ss:$8 sps:$4 sm:$0xff]   ;;  %v2456_v10 = vld [vmem:[#allocation5 + $0xf4] ss:$8 sps:$4 sm:$0xff]   ;;  %v2898_v16 = vrot.slane %v309_v54, %v2885_v49  ;;  %v2901_v17 = vrot.slane %v358_v60, %v2885_v49 }
  0x3c   :  { %1718 = vmatpush1.bf16.msra.mxu1 %v2400_v22  ;;  %v2458_v11 = vld [vmem:[#allocation5 + $0x4f4] ss:$8 sps:$4 sm:$0xff]   ;;  %v2460_v12 = vld [vmem:[#allocation5 + $0xf0] ss:$8 sps:$4 sm:$0xff]   ;;  %v2465_v14 = vld [vmem:[#allocation5 + $0x104] ss:$8 sps:$4 sm:$0xff]  }
  0x3d   :  { %1882 = vmatpush1.bf16.msra.mxu0 %v2401_v23  ;;  %1719 = vmatprep.subr.bf16.mxu1 %v2402_v24  ;;  %v339_v61 = vrot.slane %v317_v59, %v2885_v49  ;;  %v388_v3 = vrot.slane %v366_v62, %v2885_v49  ;;  %v2461_v13 = vld [vmem:[#allocation5 + $0x4f0] ss:$8 sps:$4 sm:$0xff]   ;;  %v2469_v15 = vld [vmem:[#allocation5 + $0x504] ss:$8 sps:$4 sm:$0xff]   ;;  %v2463_v18 = vld [vmem:[#allocation5 + $0x100] ss:$8 sps:$4 sm:$0xff]  }
  0x3e   :  { %1883 = vmatprep.subr.bf16.mxu0 %v2404_v25  ;;  %v2467_v19 = vld [vmem:[#allocation5 + $0x500] ss:$8 sps:$4 sm:$0xff]   ;;  %v2472_v20 = vld [vmem:[#allocation5 + $0x114] ss:$8 sps:$4 sm:$0xff]   ;;  %v2470_v24 = vld [vmem:[#allocation5 + $0x110] ss:$8 sps:$4 sm:$0xff]  }
  0x3f   :  { %1739 = vmatprep.mubr.bf16.mxu1 %v339_v61  ;;  %1903 = vmatprep.mubr.bf16.mxu0 %v388_v3  ;;  %v2475_v21 = vld [vmem:[#allocation5 + $0x514] ss:$8 sps:$4 sm:$0xff]   ;;  %v349_v22 = vcombine.high %v339_v61, %v339_v61  ;;  %v398_v23 = vcombine.high %v388_v3, %v388_v3  ;;  %v2473_v25 = vld [vmem:[#allocation5 + $0x510] ss:$8 sps:$4 sm:$0xff]   ;;  %v2488_v36 = vld [vmem:[#allocation5 + $0x140] ss:$8 sps:$4 sm:$0xff]  }
  0x40   :  { %1720 = vmatpush1.bf16.msra.mxu1 %v2406_v26  ;;  %v2478_v26 = vld [vmem:[#allocation5 + $0x124] ss:$8 sps:$4 sm:$0xff]   ;;  %v2491_v37 = vld [vmem:[#allocation5 + $0x540] ss:$8 sps:$4 sm:$0xff]   ;;  %v2497_v42 = vld [vmem:[#allocation5 + $0x550] ss:$8 sps:$4 sm:$0xff]  }
  0x41   :  { %1884 = vmatpush1.bf16.msra.mxu0 %v2407_v27  ;;  %1721 = vmatprep.subr.bf16.mxu1 %v2408_v28  ;;  %v2481_v27 = vld [vmem:[#allocation5 + $0x524] ss:$8 sps:$4 sm:$0xff]   ;;  %v2476_v28 = vld [vmem:[#allocation5 + $0x120] ss:$8 sps:$4 sm:$0xff]   ;;  %v2520_v59 = vld [vmem:[#allocation5 + $0x194] ss:$8 sps:$4 sm:$0xff]  }
  0x42   :  { %1885 = vmatprep.subr.bf16.mxu0 %v2410_v29  ;;  %v2479_v29 = vld [vmem:[#allocation5 + $0x520] ss:$8 sps:$4 sm:$0xff]   ;;  %v2514_v54 = vld [vmem:[#allocation5 + $0x184] ss:$8 sps:$4 sm:$0xff]   ;;  %v2523_v60 = vld [vmem:[#allocation5 + $0x594] ss:$8 sps:$4 sm:$0xff]  }
  0x43   :  { %v2518_v61 = vld [vmem:[#allocation5 + $0x190] ss:$8 sps:$4 sm:$0xff]   ;;  %v2532_v3 = vld [vmem:[#allocation5 + $0x1b4] ss:$8 sps:$4 sm:$0xff]  }
  0x44   :  { %1722 = vmatpush1.bf16.msra.mxu1 %v2412_v30  ;;  %v2484_v30 = vld [vmem:[#allocation5 + $0x134] ss:$8 sps:$4 sm:$0xff]   ;;  %v2521_v62 = vld [vmem:[#allocation5 + $0x590] ss:$8 sps:$4 sm:$0xff]  }
  0x45   :  { %1886 = vmatpush1.bf16.msra.mxu0 %v2413_v31  ;;  %1723 = vmatprep.subr.bf16.mxu1 %v2414_v32  ;;  %v2487_v31 = vld [vmem:[#allocation5 + $0x534] ss:$8 sps:$4 sm:$0xff]   ;;  %v2482_v32 = vld [vmem:[#allocation5 + $0x130] ss:$8 sps:$4 sm:$0xff]  }
  0x46   :  { %1887 = vmatprep.subr.bf16.mxu0 %v2416_v33  ;;  %v2485_v33 = vld [vmem:[#allocation5 + $0x530] ss:$8 sps:$4 sm:$0xff]  }
  0x48   :  { %1724 = vmatpush1.bf16.msra.mxu1 %v2418_v34  ;;  %v2490_v34 = vld [vmem:[#allocation5 + $0x144] ss:$8 sps:$4 sm:$0xff]  }
  0x49   :  { %1888 = vmatpush1.bf16.msra.mxu0 %v2419_v35  ;;  %1725 = vmatprep.subr.bf16.mxu1 %v2420_v39  ;;  %v2493_v35 = vld [vmem:[#allocation5 + $0x544] ss:$8 sps:$4 sm:$0xff]   ;;  %v2496_v39 = vld [vmem:[#allocation5 + $0x154] ss:$8 sps:$4 sm:$0xff]  }
  0x4a   :  { %1889 = vmatprep.subr.bf16.mxu0 %v2422_v40  ;;  %v2499_v40 = vld [vmem:[#allocation5 + $0x554] ss:$8 sps:$4 sm:$0xff]  }
  0x4c   :  { %1726 = vmatpush1.bf16.msra.mxu1 %v2424_v41  ;;  %v2494_v41 = vld [vmem:[#allocation5 + $0x150] ss:$8 sps:$4 sm:$0xff]  }
  0x4d   :  { %1890 = vmatpush1.bf16.msra.mxu0 %v2425_v44  ;;  %1727 = vmatprep.subr.bf16.mxu1 %v2426_v45  ;;  %v2502_v44 = vld [vmem:[#allocation5 + $0x164] ss:$8 sps:$4 sm:$0xff]  }
  0x4e   :  { %1891 = vmatprep.subr.bf16.mxu0 %v2428_v46  ;;  %v2505_v45 = vld [vmem:[#allocation5 + $0x564] ss:$8 sps:$4 sm:$0xff]   ;;  %v2500_v46 = vld [vmem:[#allocation5 + $0x160] ss:$8 sps:$4 sm:$0xff]  }
  0x50   :  { %1728 = vmatpush1.bf16.msra.mxu1 %v2430_v47  ;;  %v2503_v47 = vld [vmem:[#allocation5 + $0x560] ss:$8 sps:$4 sm:$0xff]  }
  0x51   :  { %1892 = vmatpush1.bf16.msra.mxu0 %v2431_v48  ;;  %1729 = vmatprep.subr.bf16.mxu1 %v2432_v50  ;;  %v2508_v48 = vld [vmem:[#allocation5 + $0x174] ss:$8 sps:$4 sm:$0xff]  }
  0x52   :  { %1893 = vmatprep.subr.bf16.mxu0 %v2434_v51  ;;  %v2511_v50 = vld [vmem:[#allocation5 + $0x574] ss:$8 sps:$4 sm:$0xff]   ;;  %v2506_v51 = vld [vmem:[#allocation5 + $0x170] ss:$8 sps:$4 sm:$0xff]  }
  0x54   :  { %1730 = vmatpush1.bf16.msra.mxu1 %v2436_v53  ;;  %v2509_v53 = vld [vmem:[#allocation5 + $0x570] ss:$8 sps:$4 sm:$0xff]  }
  0x55   :  { %1894 = vmatpush1.bf16.msra.mxu0 %v2437_v55  ;;  %1731 = vmatprep.subr.bf16.mxu1 %v2438_v57  ;;  %v2517_v55 = vld [vmem:[#allocation5 + $0x584] ss:$8 sps:$4 sm:$0xff]   ;;  %v2512_v57 = vld [vmem:[#allocation5 + $0x180] ss:$8 sps:$4 sm:$0xff]  }
  0x56   :  { %1895 = vmatprep.subr.bf16.mxu0 %v2440_v58  ;;  %v2515_v58 = vld [vmem:[#allocation5 + $0x580] ss:$8 sps:$4 sm:$0xff]  }
  0x58   :  { %1732 = vmatpush1.bf16.msra.mxu1 %v2442_v63  ;;  %v2526_v63 = vld [vmem:[#allocation5 + $0x1a4] ss:$8 sps:$4 sm:$0xff]  }
  0x59   :  { %1896 = vmatpush1.bf16.msra.mxu0 %v2443_v0  ;;  %1733 = vmatprep.subr.bf16.mxu1 %v2444_v1  ;;  %v2529_v0 = vld [vmem:[#allocation5 + $0x5a4] ss:$8 sps:$4 sm:$0xff]   ;;  %v2524_v1 = vld [vmem:[#allocation5 + $0x1a0] ss:$8 sps:$4 sm:$0xff]  }
  0x5a   :  { %1897 = vmatprep.subr.bf16.mxu0 %v2446_v2  ;;  %v2527_v2 = vld [vmem:[#allocation5 + $0x5a0] ss:$8 sps:$4 sm:$0xff]  }
  0x5c   :  { %1734 = vmatpush1.bf16.msra.mxu1 %v2448_v4  ;;  %v2535_v4 = vld [vmem:[#allocation5 + $0x5b4] ss:$8 sps:$4 sm:$0xff]  }
  0x5d   :  { %1898 = vmatpush1.bf16.msra.mxu0 %v2449_v5  ;;  %1735 = vmatprep.subr.bf16.mxu1 %v2450_v6  ;;  %v2530_v5 = vld [vmem:[#allocation5 + $0x1b0] ss:$8 sps:$4 sm:$0xff]  }
  0x5e   :  { %1899 = vmatprep.subr.bf16.mxu0 %v2452_v7  ;;  %v2533_v6 = vld [vmem:[#allocation5 + $0x5b0] ss:$8 sps:$4 sm:$0xff]   ;;  %v2538_v7 = vld [vmem:[#allocation5 + $0x1c4] ss:$8 sps:$4 sm:$0xff]  }
  0x60   :  { %1736 = vmatpush1.bf16.msra.mxu1 %v2454_v8  ;;  %v2541_v8 = vld [vmem:[#allocation5 + $0x5c4] ss:$8 sps:$4 sm:$0xff]  }
  0x61   :  { %1900 = vmatpush1.bf16.msra.mxu0 %v2455_v9  ;;  %1737 = vmatprep.subr.bf16.mxu1 %v2456_v10  ;;  %v2536_v9 = vld [vmem:[#allocation5 + $0x1c0] ss:$8 sps:$4 sm:$0xff]  }
  0x62   :  { %1901 = vmatprep.subr.bf16.mxu0 %v2458_v11  ;;  %v2539_v10 = vld [vmem:[#allocation5 + $0x5c0] ss:$8 sps:$4 sm:$0xff]   ;;  %v2544_v11 = vld [vmem:[#allocation5 + $0x1d4] ss:$8 sps:$4 sm:$0xff]  }
  0x64   :  { %1738 = vmatpush1.bf16.msra.mxu1 %v2460_v12  ;;  %v2547_v12 = vld [vmem:[#allocation5 + $0x5d4] ss:$8 sps:$4 sm:$0xff]  }
  0x65   :  { %1902 = vmatpush1.bf16.msra.mxu0 %v2461_v13  ;;  %1748 = vmatprep.subr.bf16.mxu1 %v2465_v14  ;;  %v2542_v13 = vld [vmem:[#allocation5 + $0x1d0] ss:$8 sps:$4 sm:$0xff]  }
  0x66   :  { %1912 = vmatprep.subr.bf16.mxu0 %v2469_v15  ;;  %v2545_v14 = vld [vmem:[#allocation5 + $0x5d0] ss:$8 sps:$4 sm:$0xff]   ;;  %v2550_v15 = vld [vmem:[#allocation5 + $0x1e4] ss:$8 sps:$4 sm:$0xff]  }
  0x67   :  { %1740 = vmatmul.mubr.bf16.vlgmr.msra.gmra.mrb[0].mxu1 %v2898_v16 }
  0x68   :  { %1904 = vmatmul.mubr.bf16.vlgmr.msra.gmra.mrb[0].mxu0 %v2901_v17  ;;  %1749 = vmatpush1.bf16.msra.mxu1 %v2463_v18  ;;  %v2553_v18 = vld [vmem:[#allocation5 + $0x5e4] ss:$8 sps:$4 sm:$0xff]  }
  0x69   :  { %1913 = vmatpush1.bf16.msra.mxu0 %v2467_v19  ;;  %1750 = vmatprep.subr.bf16.mxu1 %v2472_v20  ;;  %v302_v19 = vcombine.high %v2887_v52, %v2887_v52  ;;  %v351_v20 = vcombine.high %v2891_v56, %v2891_v56  ;;  %v2554_v52 = vld [vmem:[#allocation5 + $0x1f0] ss:$8 sps:$4 sm:$0xff]   ;;  %v2562_v56 = vld [vmem:[#allocation5 + $0x204] ss:$8 sps:$4 sm:$0xff]  }
  0x6a   :  { %1914 = vmatprep.subr.bf16.mxu0 %v2475_v21  ;;  %1780 = vmatprep.mubr.bf16.mxu1 %v349_v22  ;;  %v2548_v21 = vld [vmem:[#allocation5 + $0x1e0] ss:$8 sps:$4 sm:$0xff]  }
  0x6b   :  { %1944 = vmatprep.mubr.bf16.mxu0 %v398_v23  ;;  %v2551_v22 = vld [vmem:[#allocation5 + $0x5e0] ss:$8 sps:$4 sm:$0xff]   ;;  %v2556_v23 = vld [vmem:[#allocation5 + $0x1f4] ss:$8 sps:$4 sm:$0xff]  }
  0x6c   :  { %1751 = vmatpush1.bf16.msra.mxu1 %v2470_v24  ;;  %v2559_v24 = vld [vmem:[#allocation5 + $0x5f4] ss:$8 sps:$4 sm:$0xff]  }
  0x6d   :  { %1915 = vmatpush1.bf16.msra.mxu0 %v2473_v25  ;;  %1752 = vmatprep.subr.bf16.mxu1 %v2478_v26  ;;  %v2910_v25 = vrot.slane %v302_v19, %v2885_v49  ;;  %v2913_v26 = vrot.slane %v351_v20, %v2885_v49  ;;  %v2631_v19 = vld [vmem:[#allocation5 + $0x6b4] ss:$8 sps:$4 sm:$0xff]   ;;  %v2626_v20 = vld [vmem:[#allocation5 + $0x2b0] ss:$8 sps:$4 sm:$0xff]  }
  0x6e   :  { %1916 = vmatprep.subr.bf16.mxu0 %v2481_v27  ;;  %v2557_v27 = vld [vmem:[#allocation5 + $0x5f0] ss:$8 sps:$4 sm:$0xff]  }
  0x70   :  { %1753 = vmatpush1.bf16.msra.mxu1 %v2476_v28  ;;  %v2565_v28 = vld [vmem:[#allocation5 + $0x604] ss:$8 sps:$4 sm:$0xff]  }
  0x71   :  { %1917 = vmatpush1.bf16.msra.mxu0 %v2479_v29  ;;  %1754 = vmatprep.subr.bf16.mxu1 %v2484_v30  ;;  %v318_v29 = vcombine.high %v2910_v25, %v2910_v25  ;;  %v367_v30 = vcombine.high %v2913_v26, %v2913_v26 }
  0x72   :  { %1918 = vmatprep.subr.bf16.mxu0 %v2487_v31  ;;  %v347_v31 = vcombine.high %v2898_v16, %v2898_v16  ;;  %v2566_v16 = vld [vmem:[#allocation5 + $0x210] ss:$8 sps:$4 sm:$0xff]  }
  0x74   :  { %1755 = vmatpush1.bf16.msra.mxu1 %v2482_v32  ;;  %v396_v32 = vcombine.high %v2901_v17, %v2901_v17  ;;  %v2569_v17 = vld [vmem:[#allocation5 + $0x610] ss:$8 sps:$4 sm:$0xff]  }
  0x75   :  { %1919 = vmatpush1.bf16.msra.mxu0 %v2485_v33  ;;  %1756 = vmatprep.subr.bf16.mxu1 %v2490_v34  ;;  %v2560_v33 = vld [vmem:[#allocation5 + $0x200] ss:$8 sps:$4 sm:$0xff]  }
  0x76   :  { %1920 = vmatprep.subr.bf16.mxu0 %v2493_v35  ;;  %v2563_v34 = vld [vmem:[#allocation5 + $0x600] ss:$8 sps:$4 sm:$0xff]   ;;  %v2568_v35 = vld [vmem:[#allocation5 + $0x214] ss:$8 sps:$4 sm:$0xff]  }
  0x78   :  { %1757 = vmatpush1.bf16.msra.mxu1 %v2488_v36  ;;  %v2571_v36 = vld [vmem:[#allocation5 + $0x614] ss:$8 sps:$4 sm:$0xff]  }
  0x79   :  { %1921 = vmatpush1.bf16.msra.mxu0 %v2491_v37  ;;  %1758 = vmatprep.subr.bf16.mxu1 %v2496_v39  ;;  %v2924_v37 = vrot.slane %v318_v29, %v2885_v49  ;;  %v2927_v39 = vrot.slane %v367_v30, %v2885_v49  ;;  %v2641_v29 = vld [vmem:[#allocation5 + $0x6d0] ss:$8 sps:$4 sm:$0xff]   ;;  %v2646_v30 = vld [vmem:[#allocation5 + $0x2e4] ss:$8 sps:$4 sm:$0xff]  }
  0x7a   :  { %1922 = vmatprep.subr.bf16.mxu0 %v2499_v40  ;;  %v2574_v40 = vld [vmem:[#allocation5 + $0x224] ss:$8 sps:$4 sm:$0xff]  }
  0x7c   :  { %1759 = vmatpush1.bf16.msra.mxu1 %v2494_v41  ;;  %v2577_v41 = vld [vmem:[#allocation5 + $0x624] ss:$8 sps:$4 sm:$0xff]  }
  0x7d   :  { %1923 = vmatpush1.bf16.msra.mxu0 %v2497_v42  ;;  %1760 = vmatprep.subr.bf16.mxu1 %v2502_v44  ;;  %v2572_v42 = vld [vmem:[#allocation5 + $0x220] ss:$8 sps:$4 sm:$0xff]  }
  0x7e   :  { %1924 = vmatprep.subr.bf16.mxu0 %v2505_v45  ;;  %v2575_v44 = vld [vmem:[#allocation5 + $0x620] ss:$8 sps:$4 sm:$0xff]   ;;  %v2580_v45 = vld [vmem:[#allocation5 + $0x234] ss:$8 sps:$4 sm:$0xff]  }
  0x80   :  { %1761 = vmatpush1.bf16.msra.mxu1 %v2500_v46  ;;  %v2583_v46 = vld [vmem:[#allocation5 + $0x634] ss:$8 sps:$4 sm:$0xff]  }
  0x81   :  { %1925 = vmatpush1.bf16.msra.mxu0 %v2503_v47  ;;  %1762 = vmatprep.subr.bf16.mxu1 %v2508_v48  ;;  %v2578_v47 = vld [vmem:[#allocation5 + $0x230] ss:$8 sps:$4 sm:$0xff]  }
  0x82   :  { %1926 = vmatprep.subr.bf16.mxu0 %v2511_v50  ;;  %v2581_v48 = vld [vmem:[#allocation5 + $0x630] ss:$8 sps:$4 sm:$0xff]   ;;  %v2586_v50 = vld [vmem:[#allocation5 + $0x244] ss:$8 sps:$4 sm:$0xff]  }
  0x84   :  { %1763 = vmatpush1.bf16.msra.mxu1 %v2506_v51  ;;  %v2589_v51 = vld [vmem:[#allocation5 + $0x644] ss:$8 sps:$4 sm:$0xff]  }
  0x85   :  { %1927 = vmatpush1.bf16.msra.mxu0 %v2509_v53  ;;  %1764 = vmatprep.subr.bf16.mxu1 %v2514_v54  ;;  %v2584_v53 = vld [vmem:[#allocation5 + $0x240] ss:$8 sps:$4 sm:$0xff]  }
  0x86   :  { %1928 = vmatprep.subr.bf16.mxu0 %v2517_v55  ;;  %v2587_v54 = vld [vmem:[#allocation5 + $0x640] ss:$8 sps:$4 sm:$0xff]   ;;  %v2592_v55 = vld [vmem:[#allocation5 + $0x254] ss:$8 sps:$4 sm:$0xff]  }
  0x88   :  { %1765 = vmatpush1.bf16.msra.mxu1 %v2512_v57  ;;  %v2595_v57 = vld [vmem:[#allocation5 + $0x654] ss:$8 sps:$4 sm:$0xff]  }
  0x89   :  { %1929 = vmatpush1.bf16.msra.mxu0 %v2515_v58  ;;  %1766 = vmatprep.subr.bf16.mxu1 %v2520_v59  ;;  %v2590_v58 = vld [vmem:[#allocation5 + $0x250] ss:$8 sps:$4 sm:$0xff]  }
  0x8a   :  { %1930 = vmatprep.subr.bf16.mxu0 %v2523_v60  ;;  %v2593_v59 = vld [vmem:[#allocation5 + $0x650] ss:$8 sps:$4 sm:$0xff]   ;;  %v2598_v60 = vld [vmem:[#allocation5 + $0x264] ss:$8 sps:$4 sm:$0xff]  }
  0x8c   :  { %1767 = vmatpush1.bf16.msra.mxu1 %v2518_v61  ;;  %v2601_v61 = vld [vmem:[#allocation5 + $0x664] ss:$8 sps:$4 sm:$0xff]  }
  0x8d   :  { %1931 = vmatpush1.bf16.msra.mxu0 %v2521_v62  ;;  %1768 = vmatprep.subr.bf16.mxu1 %v2526_v63  ;;  %v2596_v62 = vld [vmem:[#allocation5 + $0x260] ss:$8 sps:$4 sm:$0xff]  }
  0x8e   :  { %1932 = vmatprep.subr.bf16.mxu0 %v2529_v0  ;;  %v2599_v63 = vld [vmem:[#allocation5 + $0x660] ss:$8 sps:$4 sm:$0xff]   ;;  %v2604_v0 = vld [vmem:[#allocation5 + $0x274] ss:$8 sps:$4 sm:$0xff]  }
  0x90   :  { %1769 = vmatpush1.bf16.msra.mxu1 %v2524_v1  ;;  %v2607_v1 = vld [vmem:[#allocation5 + $0x674] ss:$8 sps:$4 sm:$0xff]  }
  0x91   :  { %1933 = vmatpush1.bf16.msra.mxu0 %v2527_v2  ;;  %1770 = vmatprep.subr.bf16.mxu1 %v2532_v3  ;;  %v2602_v2 = vld [vmem:[#allocation5 + $0x270] ss:$8 sps:$4 sm:$0xff]  }
  0x92   :  { %1934 = vmatprep.subr.bf16.mxu0 %v2535_v4  ;;  %v2605_v3 = vld [vmem:[#allocation5 + $0x670] ss:$8 sps:$4 sm:$0xff]   ;;  %v2610_v4 = vld [vmem:[#allocation5 + $0x284] ss:$8 sps:$4 sm:$0xff]  }
  0x94   :  { %1771 = vmatpush1.bf16.msra.mxu1 %v2530_v5  ;;  %v2613_v5 = vld [vmem:[#allocation5 + $0x684] ss:$8 sps:$4 sm:$0xff]  }
  0x95   :  { %1935 = vmatpush1.bf16.msra.mxu0 %v2533_v6  ;;  %1772 = vmatprep.subr.bf16.mxu1 %v2538_v7  ;;  %v2608_v6 = vld [vmem:[#allocation5 + $0x280] ss:$8 sps:$4 sm:$0xff]  }
  0x96   :  { %1936 = vmatprep.subr.bf16.mxu0 %v2541_v8  ;;  %v2611_v7 = vld [vmem:[#allocation5 + $0x680] ss:$8 sps:$4 sm:$0xff]   ;;  %v2616_v8 = vld [vmem:[#allocation5 + $0x294] ss:$8 sps:$4 sm:$0xff]  }
  0x98   :  { %1773 = vmatpush1.bf16.msra.mxu1 %v2536_v9  ;;  %v2619_v9 = vld [vmem:[#allocation5 + $0x694] ss:$8 sps:$4 sm:$0xff]  }
  0x99   :  { %1937 = vmatpush1.bf16.msra.mxu0 %v2539_v10  ;;  %1774 = vmatprep.subr.bf16.mxu1 %v2544_v11  ;;  %v2614_v10 = vld [vmem:[#allocation5 + $0x290] ss:$8 sps:$4 sm:$0xff]  }
  0x9a   :  { %1938 = vmatprep.subr.bf16.mxu0 %v2547_v12  ;;  %v2617_v11 = vld [vmem:[#allocation5 + $0x690] ss:$8 sps:$4 sm:$0xff]   ;;  %v2622_v12 = vld [vmem:[#allocation5 + $0x2a4] ss:$8 sps:$4 sm:$0xff]  }
  0x9c   :  { %1775 = vmatpush1.bf16.msra.mxu1 %v2542_v13  ;;  %v2625_v13 = vld [vmem:[#allocation5 + $0x6a4] ss:$8 sps:$4 sm:$0xff]  }
  0x9d   :  { %1939 = vmatpush1.bf16.msra.mxu0 %v2545_v14  ;;  %1776 = vmatprep.subr.bf16.mxu1 %v2550_v15  ;;  %v2620_v14 = vld [vmem:[#allocation5 + $0x2a0] ss:$8 sps:$4 sm:$0xff]  }
  0x9e   :  { %1940 = vmatprep.subr.bf16.mxu0 %v2553_v18  ;;  %v2623_v15 = vld [vmem:[#allocation5 + $0x6a0] ss:$8 sps:$4 sm:$0xff]   ;;  %v2628_v18 = vld [vmem:[#allocation5 + $0x2b4] ss:$8 sps:$4 sm:$0xff]  }
  0xa0   :  { %1777 = vmatpush1.bf16.msra.mxu1 %v2548_v21  ;;  %v2629_v21 = vld [vmem:[#allocation5 + $0x6b0] ss:$8 sps:$4 sm:$0xff]  }
  0xa1   :  { %1941 = vmatpush1.bf16.msra.mxu0 %v2551_v22  ;;  %1778 = vmatprep.subr.bf16.mxu1 %v2556_v23  ;;  %v2634_v22 = vld [vmem:[#allocation5 + $0x2c4] ss:$8 sps:$4 sm:$0xff]  }
  0xa2   :  { %1942 = vmatprep.subr.bf16.mxu0 %v2559_v24  ;;  %v2637_v23 = vld [vmem:[#allocation5 + $0x6c4] ss:$8 sps:$4 sm:$0xff]   ;;  %v2632_v24 = vld [vmem:[#allocation5 + $0x2c0] ss:$8 sps:$4 sm:$0xff]  }
  0xa4   :  { %1779 = vmatpush1.bf16.msra.mxu1 %v2554_v52  ;;  %v2635_v52 = vld [vmem:[#allocation5 + $0x6c0] ss:$8 sps:$4 sm:$0xff]  }
  0xa5   :  { %1943 = vmatpush1.bf16.msra.mxu0 %v2557_v27  ;;  %1789 = vmatprep.subr.bf16.mxu1 %v2562_v56  ;;  %v2640_v27 = vld [vmem:[#allocation5 + $0x2d4] ss:$8 sps:$4 sm:$0xff]  }
  0xa6   :  { %1953 = vmatprep.subr.bf16.mxu0 %v2565_v28  ;;  %v2643_v56 = vld [vmem:[#allocation5 + $0x6d4] ss:$8 sps:$4 sm:$0xff]   ;;  %v2638_v28 = vld [vmem:[#allocation5 + $0x2d0] ss:$8 sps:$4 sm:$0xff]  }
  0xa7   :  { %1781 = vmatmul.mubr.bf16.vlgmr.msra.gmra.mrb[0].mxu1 %v347_v31  ;;  %v2649_v31 = vld [vmem:[#allocation5 + $0x6e4] ss:$8 sps:$4 sm:$0xff]  }
  0xa8   :  { %1945 = vmatmul.mubr.bf16.vlgmr.msra.gmra.mrb[0].mxu0 %v396_v32  ;;  %1790 = vmatpush1.bf16.msra.mxu1 %v2560_v33  ;;  %v2644_v32 = vld [vmem:[#allocation5 + $0x2e0] ss:$8 sps:$4 sm:$0xff]  }
  0xa9   :  { %1954 = vmatpush1.bf16.msra.mxu0 %v2563_v34  ;;  %1791 = vmatprep.subr.bf16.mxu1 %v2568_v35  ;;  %v2647_v33 = vld [vmem:[#allocation5 + $0x6e0] ss:$8 sps:$4 sm:$0xff]   ;;  %v2652_v34 = vld [vmem:[#allocation5 + $0x2f4] ss:$8 sps:$4 sm:$0xff]  }
  0xaa   :  { %1955 = vmatprep.subr.bf16.mxu0 %v2571_v36  ;;  %1821 = vmatprep.mubr.bf16.mxu1 %v2924_v37  ;;  %v2655_v35 = vld [vmem:[#allocation5 + $0x6f4] ss:$8 sps:$4 sm:$0xff]   ;;  %v2650_v36 = vld [vmem:[#allocation5 + $0x2f0] ss:$8 sps:$4 sm:$0xff]  }
  0xab   :  { %1985 = vmatprep.mubr.bf16.mxu0 %v2927_v39 }
  0xac   :  { %1792 = vmatpush1.bf16.msra.mxu1 %v2566_v16  ;;  %v2653_v16 = vld [vmem:[#allocation5 + $0x6f0] ss:$8 sps:$4 sm:$0xff]  }
  0xad   :  { %1956 = vmatpush1.bf16.msra.mxu0 %v2569_v17  ;;  %1793 = vmatprep.subr.bf16.mxu1 %v2574_v40  ;;  %v2658_v17 = vld [vmem:[#allocation5 + $0x304] ss:$8 sps:$4 sm:$0xff]  }
  0xae   :  { %1957 = vmatprep.subr.bf16.mxu0 %v2577_v41  ;;  %v2661_v40 = vld [vmem:[#allocation5 + $0x704] ss:$8 sps:$4 sm:$0xff]   ;;  %v2933_v41 = vrot.slane %v2910_v25, %v2885_v49  ;;  %v2662_v25 = vld [vmem:[#allocation5 + $0x310] ss:$8 sps:$4 sm:$0xff]  }
  0xb0   :  { %1794 = vmatpush1.bf16.msra.mxu1 %v2572_v42  ;;  %v2937_v42 = vrot.slane %v2913_v26, %v2885_v49  ;;  %v2665_v26 = vld [vmem:[#allocation5 + $0x710] ss:$8 sps:$4 sm:$0xff]  }
  0xb1   :  { %1958 = vmatpush1.bf16.msra.mxu0 %v2575_v44  ;;  %1795 = vmatprep.subr.bf16.mxu1 %v2580_v45  ;;  %v2656_v44 = vld [vmem:[#allocation5 + $0x300] ss:$8 sps:$4 sm:$0xff]  }
  0xb2   :  { %1959 = vmatprep.subr.bf16.mxu0 %v2583_v46  ;;  %v2659_v45 = vld [vmem:[#allocation5 + $0x700] ss:$8 sps:$4 sm:$0xff]   ;;  %v2664_v46 = vld [vmem:[#allocation5 + $0x314] ss:$8 sps:$4 sm:$0xff]  }
  0xb4   :  { %1796 = vmatpush1.bf16.msra.mxu1 %v2578_v47  ;;  %v2667_v47 = vld [vmem:[#allocation5 + $0x714] ss:$8 sps:$4 sm:$0xff]  }
  0xb5   :  { %1960 = vmatpush1.bf16.msra.mxu0 %v2581_v48  ;;  %1797 = vmatprep.subr.bf16.mxu1 %v2586_v50  ;;  %v350_v48 = vcombine.high %v2924_v37, %v2924_v37  ;;  %v399_v50 = vcombine.high %v2927_v39, %v2927_v39  ;;  %v2668_v37 = vld [vmem:[#allocation5 + $0x320] ss:$8 sps:$4 sm:$0xff]   ;;  %v2676_v39 = vld [vmem:[#allocation5 + $0x334] ss:$8 sps:$4 sm:$0xff]  }
  0xb6   :  { %1961 = vmatprep.subr.bf16.mxu0 %v2589_v51  ;;  %v2670_v51 = vld [vmem:[#allocation5 + $0x324] ss:$8 sps:$4 sm:$0xff]  }
  0xb8   :  { %1798 = vmatpush1.bf16.msra.mxu1 %v2584_v53  ;;  %v2673_v53 = vld [vmem:[#allocation5 + $0x724] ss:$8 sps:$4 sm:$0xff]  }
  0xb9   :  { %1962 = vmatpush1.bf16.msra.mxu0 %v2587_v54  ;;  %1799 = vmatprep.subr.bf16.mxu1 %v2592_v55  ;;  %v2671_v54 = vld [vmem:[#allocation5 + $0x720] ss:$8 sps:$4 sm:$0xff]   ;;  %v2679_v55 = vld [vmem:[#allocation5 + $0x734] ss:$8 sps:$4 sm:$0xff]  }
  0xba   :  { %1963 = vmatprep.subr.bf16.mxu0 %v2595_v57  ;;  %v2674_v57 = vld [vmem:[#allocation5 + $0x330] ss:$8 sps:$4 sm:$0xff]  }
  0xbc   :  { %1800 = vmatpush1.bf16.msra.mxu1 %v2590_v58  ;;  %v2677_v58 = vld [vmem:[#allocation5 + $0x730] ss:$8 sps:$4 sm:$0xff]  }
  0xbd   :  { %1964 = vmatpush1.bf16.msra.mxu0 %v2593_v59  ;;  %1801 = vmatprep.subr.bf16.mxu1 %v2598_v60  ;;  %v2682_v59 = vld [vmem:[#allocation5 + $0x344] ss:$8 sps:$4 sm:$0xff]  }
  0xbe   :  { %1965 = vmatprep.subr.bf16.mxu0 %v2601_v61  ;;  %v2685_v60 = vld [vmem:[#allocation5 + $0x744] ss:$8 sps:$4 sm:$0xff]   ;;  %v2680_v61 = vld [vmem:[#allocation5 + $0x340] ss:$8 sps:$4 sm:$0xff]  }
  0xc0   :  { %1802 = vmatpush1.bf16.msra.mxu1 %v2596_v62  ;;  %v2683_v62 = vld [vmem:[#allocation5 + $0x740] ss:$8 sps:$4 sm:$0xff]  }
  0xc1   :  { %1966 = vmatpush1.bf16.msra.mxu0 %v2599_v63  ;;  %1803 = vmatprep.subr.bf16.mxu1 %v2604_v0  ;;  %v2688_v63 = vld [vmem:[#allocation5 + $0x354] ss:$8 sps:$4 sm:$0xff]  }
  0xc2   :  { %1967 = vmatprep.subr.bf16.mxu0 %v2607_v1  ;;  %v2691_v0 = vld [vmem:[#allocation5 + $0x754] ss:$8 sps:$4 sm:$0xff]   ;;  %v2686_v1 = vld [vmem:[#allocation5 + $0x350] ss:$8 sps:$4 sm:$0xff]  }
  0xc4   :  { %1804 = vmatpush1.bf16.msra.mxu1 %v2602_v2  ;;  %v2689_v2 = vld [vmem:[#allocation5 + $0x750] ss:$8 sps:$4 sm:$0xff]  }
  0xc5   :  { %1968 = vmatpush1.bf16.msra.mxu0 %v2605_v3  ;;  %1805 = vmatprep.subr.bf16.mxu1 %v2610_v4  ;;  %v2694_v3 = vld [vmem:[#allocation5 + $0x364] ss:$8 sps:$4 sm:$0xff]  }
  0xc6   :  { %1969 = vmatprep.subr.bf16.mxu0 %v2613_v5  ;;  %v2697_v4 = vld [vmem:[#allocation5 + $0x764] ss:$8 sps:$4 sm:$0xff]   ;;  %v2692_v5 = vld [vmem:[#allocation5 + $0x360] ss:$8 sps:$4 sm:$0xff]  }
  0xc8   :  { %1806 = vmatpush1.bf16.msra.mxu1 %v2608_v6  ;;  %v2695_v6 = vld [vmem:[#allocation5 + $0x760] ss:$8 sps:$4 sm:$0xff]  }
  0xc9   :  { %1970 = vmatpush1.bf16.msra.mxu0 %v2611_v7  ;;  %1807 = vmatprep.subr.bf16.mxu1 %v2616_v8  ;;  %v2700_v7 = vld [vmem:[#allocation5 + $0x374] ss:$8 sps:$4 sm:$0xff]  }
  0xca   :  { %1971 = vmatprep.subr.bf16.mxu0 %v2619_v9  ;;  %v2703_v8 = vld [vmem:[#allocation5 + $0x774] ss:$8 sps:$4 sm:$0xff]   ;;  %v2698_v9 = vld [vmem:[#allocation5 + $0x370] ss:$8 sps:$4 sm:$0xff]  }
  0xcc   :  { %1808 = vmatpush1.bf16.msra.mxu1 %v2614_v10  ;;  %v2701_v10 = vld [vmem:[#allocation5 + $0x770] ss:$8 sps:$4 sm:$0xff]  }
  0xcd   :  { %1972 = vmatpush1.bf16.msra.mxu0 %v2617_v11  ;;  %1809 = vmatprep.subr.bf16.mxu1 %v2622_v12  ;;  %v2706_v11 = vld [vmem:[#allocation5 + $0x384] ss:$8 sps:$4 sm:$0xff]  }
  0xce   :  { %1973 = vmatprep.subr.bf16.mxu0 %v2625_v13  ;;  %v2709_v12 = vld [vmem:[#allocation5 + $0x784] ss:$8 sps:$4 sm:$0xff]   ;;  %v2704_v13 = vld [vmem:[#allocation5 + $0x380] ss:$8 sps:$4 sm:$0xff]  }
  0xd0   :  { %1810 = vmatpush1.bf16.msra.mxu1 %v2620_v14  ;;  %v2707_v14 = vld [vmem:[#allocation5 + $0x780] ss:$8 sps:$4 sm:$0xff]  }
  0xd1   :  { %1974 = vmatpush1.bf16.msra.mxu0 %v2623_v15  ;;  %1811 = vmatprep.subr.bf16.mxu1 %v2628_v18  ;;  %v2712_v15 = vld [vmem:[#allocation5 + $0x394] ss:$8 sps:$4 sm:$0xff]  }
  0xd2   :  { %1975 = vmatprep.subr.bf16.mxu0 %v2631_v19  ;;  %v2715_v18 = vld [vmem:[#allocation5 + $0x794] ss:$8 sps:$4 sm:$0xff]   ;;  %v2710_v19 = vld [vmem:[#allocation5 + $0x390] ss:$8 sps:$4 sm:$0xff]  }
  0xd4   :  { %1812 = vmatpush1.bf16.msra.mxu1 %v2626_v20  ;;  %v2713_v20 = vld [vmem:[#allocation5 + $0x790] ss:$8 sps:$4 sm:$0xff]  }
  0xd5   :  { %1976 = vmatpush1.bf16.msra.mxu0 %v2629_v21  ;;  %1813 = vmatprep.subr.bf16.mxu1 %v2634_v22  ;;  %v2718_v21 = vld [vmem:[#allocation5 + $0x3a4] ss:$8 sps:$4 sm:$0xff]  }
  0xd6   :  { %1977 = vmatprep.subr.bf16.mxu0 %v2637_v23  ;;  %v2721_v22 = vld [vmem:[#allocation5 + $0x7a4] ss:$8 sps:$4 sm:$0xff]   ;;  %v2716_v23 = vld [vmem:[#allocation5 + $0x3a0] ss:$8 sps:$4 sm:$0xff]  }
  0xd8   :  { %1814 = vmatpush1.bf16.msra.mxu1 %v2632_v24  ;;  %v2719_v24 = vld [vmem:[#allocation5 + $0x7a0] ss:$8 sps:$4 sm:$0xff]  }
  0xd9   :  { %1978 = vmatpush1.bf16.msra.mxu0 %v2635_v52  ;;  %1815 = vmatprep.subr.bf16.mxu1 %v2640_v27  ;;  %v2724_v52 = vld [vmem:[#allocation5 + $0x3b4] ss:$8 sps:$4 sm:$0xff]  }
  0xda   :  { %1979 = vmatprep.subr.bf16.mxu0 %v2643_v56  ;;  %v2727_v27 = vld [vmem:[#allocation5 + $0x7b4] ss:$8 sps:$4 sm:$0xff]   ;;  %v2722_v56 = vld [vmem:[#allocation5 + $0x3b0] ss:$8 sps:$4 sm:$0xff]  }
  0xdc   :  { %1816 = vmatpush1.bf16.msra.mxu1 %v2638_v28  ;;  %v2725_v28 = vld [vmem:[#allocation5 + $0x7b0] ss:$8 sps:$4 sm:$0xff]  }
  0xdd   :  { %1980 = vmatpush1.bf16.msra.mxu0 %v2641_v29  ;;  %1817 = vmatprep.subr.bf16.mxu1 %v2646_v30  ;;  %v2730_v29 = vld [vmem:[#allocation5 + $0x3c4] ss:$8 sps:$4 sm:$0xff]  }
  0xde   :  { %1981 = vmatprep.subr.bf16.mxu0 %v2649_v31  ;;  %v2733_v30 = vld [vmem:[#allocation5 + $0x7c4] ss:$8 sps:$4 sm:$0xff]   ;;  %v2728_v31 = vld [vmem:[#allocation5 + $0x3c0] ss:$8 sps:$4 sm:$0xff]  }
  0xe0   :  { %1818 = vmatpush1.bf16.msra.mxu1 %v2644_v32  ;;  %v2731_v32 = vld [vmem:[#allocation5 + $0x7c0] ss:$8 sps:$4 sm:$0xff]  }
  0xe1   :  { %1982 = vmatpush1.bf16.msra.mxu0 %v2647_v33  ;;  %1819 = vmatprep.subr.bf16.mxu1 %v2652_v34  ;;  %v2736_v33 = vld [vmem:[#allocation5 + $0x3d4] ss:$8 sps:$4 sm:$0xff]  }
  0xe2   :  { %1983 = vmatprep.subr.bf16.mxu0 %v2655_v35  ;;  %v2739_v34 = vld [vmem:[#allocation5 + $0x7d4] ss:$8 sps:$4 sm:$0xff]   ;;  %v2734_v35 = vld [vmem:[#allocation5 + $0x3d0] ss:$8 sps:$4 sm:$0xff]  }
  0xe4   :  { %1820 = vmatpush1.bf16.msra.mxu1 %v2650_v36  ;;  %v2737_v36 = vld [vmem:[#allocation5 + $0x7d0] ss:$8 sps:$4 sm:$0xff]  }
  0xe5   :  { %1984 = vmatpush1.bf16.msra.mxu0 %v2653_v16  ;;  %1830 = vmatprep.subr.bf16.mxu1 %v2658_v17  ;;  %v2742_v16 = vld [vmem:[#allocation5 + $0x3e4] ss:$8 sps:$4 sm:$0xff]  }
  0xe6   :  { %1994 = vmatprep.subr.bf16.mxu0 %v2661_v40  ;;  %v2745_v17 = vld [vmem:[#allocation5 + $0x7e4] ss:$8 sps:$4 sm:$0xff]   ;;  %v2740_v40 = vld [vmem:[#allocation5 + $0x3e0] ss:$8 sps:$4 sm:$0xff]  }
  0xe7   :  { %1822 = vmatmul.mubr.bf16.vlgmr.msra.gmra.mrb[0].mxu1 %v2933_v41 }
  0xe8   :  { %1986 = vmatmul.mubr.bf16.vlgmr.msra.gmra.mrb[0].mxu0 %v2937_v42  ;;  %1831 = vmatpush1.bf16.msra.mxu1 %v2656_v44  ;;  %v2743_v44 = vld [vmem:[#allocation5 + $0x7e0] ss:$8 sps:$4 sm:$0xff]  }
  0xe9   :  { %1995 = vmatpush1.bf16.msra.mxu0 %v2659_v45  ;;  %1832 = vmatprep.subr.bf16.mxu1 %v2664_v46  ;;  %v2748_v45 = vld [vmem:[#allocation5 + $0x3f4] ss:$8 sps:$4 sm:$0xff]  }
  0xea   :  { %1996 = vmatprep.subr.bf16.mxu0 %v2667_v47  ;;  %1862 = vmatprep.mubr.bf16.mxu1 %v350_v48  ;;  %v2751_v46 = vld [vmem:[#allocation5 + $0x7f4] ss:$8 sps:$4 sm:$0xff]   ;;  %v2746_v47 = vld [vmem:[#allocation5 + $0x3f0] ss:$8 sps:$4 sm:$0xff]  }
  0xeb   :  { %2026 = vmatprep.mubr.bf16.mxu0 %v399_v50  ;;  %v2749_v48 = vld [vmem:[#allocation5 + $0x7f0] ss:$8 sps:$4 sm:$0xff]   ;;  %v348_v50 = vcombine.high %v2933_v41, %v2933_v41 }
  0xec   :  { %1833 = vmatpush1.bf16.msra.mxu1 %v2662_v25  ;;  %v397_v25 = vcombine.high %v2937_v42, %v2937_v42 }
  0xed   :  { %1997 = vmatpush1.bf16.msra.mxu0 %v2665_v26  ;;  %1834 = vmatprep.subr.bf16.mxu1 %v2670_v51  ;;  %v1699_v26 = vsub.s32 0, %v2882_v43  ;;  %v299_v51 = vld [vmem:[%s2971_s2] sm:$0x3]  ;;  %s2829_s2 = smov [#allocation7]  }
  0xee   :  { %1998 = vmatprep.subr.bf16.mxu0 %v2673_v53  ;;  %v1703_v53 = vsub.s32 1, %v2882_v43  ;;  %s2066_s11 = sshll.u32 %s2829_s2, 4  ;;  %s2067_s11 = int_to_ptr.vmem [resolvable:$true] %s2066_s11 }
  0xef   :  { %s2796_s12 = scalar_lea.vmem %s2067_s11, 32  ;;  %p2801_p3 = scmp.lt.s32.totalorder %s2067_s11, %s2067_s11 }
  0xf0   :  { %1835 = vmatpush1.bf16.msra.mxu1 %v2668_v37  ;;  %v1700_v37 = vrot.slane %v299_v51, %v1699_v26  ;;  %p2797_p2 = scmp.ne.s32.totalorder %s2067_s11, %s2796_s12  ;;  %p2802_p4 = scmp.lt.s32.totalorder %s2796_s12, %s2796_s12 }
  0xf1   :  { %1999 = vmatpush1.bf16.msra.mxu0 %v2671_v54  ;;  %1836 = vmatprep.subr.bf16.mxu1 %v2676_v39  ;;  %v1704_v54 = vrot.slane %v299_v51, %v1703_v53 }
  0xf2   :  { %2000 = vmatprep.subr.bf16.mxu0 %v2679_v55  ;;  %p2803_p5 = por %p2802_p4, %p2801_p3 }
  0xf4   :  { %1837 = vmatpush1.bf16.msra.mxu1 %v2674_v57  ;;  %p2804_p6 = pnand %p2803_p5, %p2797_p2 }
  0xf5   :  { %2001 = vmatpush1.bf16.msra.mxu0 %v2677_v58  ;;  %1838 = vmatprep.subr.bf16.mxu1 %v2682_v59 }
  0xf6   :  { %2002 = vmatprep.subr.bf16.mxu0 %v2685_v60 }
  0xf8   :  { %1839 = vmatpush1.bf16.msra.mxu1 %v2680_v61 }
  0xf9   :  { %2003 = vmatpush1.bf16.msra.mxu0 %v2683_v62  ;;  %1840 = vmatprep.subr.bf16.mxu1 %v2688_v63 }
  0xfa   :  { %2004 = vmatprep.subr.bf16.mxu0 %v2691_v0 }
  0xfc   :  { %1841 = vmatpush1.bf16.msra.mxu1 %v2686_v1 }
  0xfd   :  { %2005 = vmatpush1.bf16.msra.mxu0 %v2689_v2  ;;  %1842 = vmatprep.subr.bf16.mxu1 %v2694_v3 }
  0xfe   :  { %2006 = vmatprep.subr.bf16.mxu0 %v2697_v4 }
 0x100   :  { %1843 = vmatpush1.bf16.msra.mxu1 %v2692_v5 }
 0x101   :  { %2007 = vmatpush1.bf16.msra.mxu0 %v2695_v6  ;;  %1844 = vmatprep.subr.bf16.mxu1 %v2700_v7 }
 0x102   :  { %2008 = vmatprep.subr.bf16.mxu0 %v2703_v8 }
 0x104   :  { %1845 = vmatpush1.bf16.msra.mxu1 %v2698_v9 }
 0x105   :  { %2009 = vmatpush1.bf16.msra.mxu0 %v2701_v10  ;;  %1846 = vmatprep.subr.bf16.mxu1 %v2706_v11 }
 0x106   :  { %2010 = vmatprep.subr.bf16.mxu0 %v2709_v12 }
 0x108   :  { %1847 = vmatpush1.bf16.msra.mxu1 %v2704_v13 }
 0x109   :  { %2011 = vmatpush1.bf16.msra.mxu0 %v2707_v14  ;;  %1848 = vmatprep.subr.bf16.mxu1 %v2712_v15 }
 0x10a   :  { %2012 = vmatprep.subr.bf16.mxu0 %v2715_v18 }
 0x10c   :  { %1849 = vmatpush1.bf16.msra.mxu1 %v2710_v19 }
 0x10d   :  { %2013 = vmatpush1.bf16.msra.mxu0 %v2713_v20  ;;  %1850 = vmatprep.subr.bf16.mxu1 %v2718_v21 }
 0x10e   :  { %2014 = vmatprep.subr.bf16.mxu0 %v2721_v22 }
 0x110   :  { %1851 = vmatpush1.bf16.msra.mxu1 %v2716_v23 }
 0x111   :  { %2015 = vmatpush1.bf16.msra.mxu0 %v2719_v24  ;;  %1852 = vmatprep.subr.bf16.mxu1 %v2724_v52 }
 0x112   :  { %2016 = vmatprep.subr.bf16.mxu0 %v2727_v27 }
 0x114   :  { %1853 = vmatpush1.bf16.msra.mxu1 %v2722_v56 }
 0x115   :  { %2017 = vmatpush1.bf16.msra.mxu0 %v2725_v28  ;;  %1854 = vmatprep.subr.bf16.mxu1 %v2730_v29 }
 0x116   :  { %2018 = vmatprep.subr.bf16.mxu0 %v2733_v30 }
 0x118   :  { %1855 = vmatpush1.bf16.msra.mxu1 %v2728_v31 }
 0x119   :  { %2019 = vmatpush1.bf16.msra.mxu0 %v2731_v32  ;;  %1856 = vmatprep.subr.bf16.mxu1 %v2736_v33 }
 0x11a   :  { %2020 = vmatprep.subr.bf16.mxu0 %v2739_v34 }
 0x11c   :  { %1857 = vmatpush1.bf16.msra.mxu1 %v2734_v35 }
 0x11d   :  { %2021 = vmatpush1.bf16.msra.mxu0 %v2737_v36  ;;  %1858 = vmatprep.subr.bf16.mxu1 %v2742_v16 }
 0x11e   :  { %2022 = vmatprep.subr.bf16.mxu0 %v2745_v17 }
 0x120   :  { %1859 = vmatpush1.bf16.msra.mxu1 %v2740_v40 }
 0x121   :  { %2023 = vmatpush1.bf16.msra.mxu0 %v2743_v44  ;;  %1860 = vmatprep.subr.bf16.mxu1 %v2748_v45 }
 0x122   :  { %2024 = vmatprep.subr.bf16.mxu0 %v2751_v46 }
 0x124   :  { %1861 = vmatpush1.bf16.msra.mxu1 %v2746_v47 }
 0x125   :  { %2025 = vmatpush1.bf16.msra.mxu0 %v2749_v48 }
 0x127   :  { %1863 = vmatmul.mubr.bf16.vlgmr.msra.gmra.mrb[0].mxu1 %v348_v50 }
 0x128   :  { %2027 = vmatmul.mubr.bf16.vlgmr.msra.gmra.mrb[0].mxu0 %v397_v25 }
 0x1fa   :  { %v1864_v39 = vpop.f32.mrb[0].mxu1 }
 0x1fb   :  { %v2028_v55 = vpop.f32.mrb[0].mxu0  ;;  %v2332_v41 = vadd.f32 %v1864_v39, %v1700_v37  ;;  %v1866_v57 = vpop.f32.mrb[1].mxu1 }
 0x1fc   :  { %v2030_v58 = vpop.f32.mrb[1].mxu0  ;;  %v2334_v42 = vadd.f32 %v1866_v57, %v1704_v54  ;;  %v1868_v59 = vpop.f32.mrb[2].mxu1 }
 0x1fd   :  { %v2032_v60 = vpop.f32.mrb[2].mxu0  ;;  %v2333_v61 = vadd.f32 %v2332_v41, %v2028_v55  ;;  %v1869_v62 = vpop.f32.mrb[3].mxu1 }
 0x1fe   :  { %v2033_v63 = vpop.f32.mrb[3].mxu0  ;;  %v2335_v0 = vadd.f32 %v2334_v42, %v2030_v58 }
 0x1ff   :  { %v2035_v1 = vmax.f32 %v2333_v61, 0.0 }
 0x200   :  { %v2036_v2 = vmax.f32 %v2335_v0, 0.0 }
 0x202   :  { %v2039_v3 = vcombine.low %v2035_v1, %v2036_v2 }
 0x204   :  { %v2046_v43 = vrot.slane %v2039_v3, %v2885_v49 }
 0x206   :  { %v2053_v4 = vrot.slane %v2046_v43, %v2885_v49 }
 0x208   :  { %2059 = vst.msk [vmem:[#allocation7] sm:$0x3] %vm2057_vm0, %v2053_v4 }
 0x209   :  { %2807 = shalt.err (!%p2804_p6)
}
 0x20a   :  { %s2808_s15 = scalar_lea.hbm %s2972_s3, 32 }
 0x20b   :  { %p2809_p7 = scmp.ne.s32.totalorder %s2972_s3, %s2808_s15  ;;  %p2812_p8 = scmp.lt.u32.totalorder %s2808_s15, %s2972_s3 }
 0x20d   :  { %p2814_p9 = pnand %p2812_p8, %p2809_p7 }
 0x20f   :  { %2817 = shalt.err (!%p2814_p9)
}
 0x210   :  { %2069 = dma.vmem_to_hbm [thread:$0]  %s2067_s11, 32, %s2972_s3, [#allocation4]  }
 0x211   :  { %2822 = dma.done.wait [#allocation4], 32  }
 0x212   :  { %2823 = vsyncadd [#allocation4], 4294967264 }
 0x213   :  { %2073 = vsyncpa [#allocation3], 1 }
 0x214   :  { %2074 = vsyncpa [#allocation6], 1 }
 0x215   :  { %2075 = vsyncpa [#allocation4], 1 }

</bundles_post_ra>
